<compile_context>
chip_gen: v7x
topology: tpu7x:2x2x1
jax: 0.10.0
libtpu: 0.0.40
codegen_flags: <defaults>
</compile_context>

<pallas_src>
import jax
import jax.numpy as jnp
import numpy as np
from jax.experimental import pallas as pl
from jax.experimental.pallas import tpu as pltpu


def _round_up(x, m):
    return ((x + m - 1) // m) * m


def _orthogonal_fusion_kernel(fl_ref, fg_row_ref, fg_col_ref, out_ref):
    # fl_ref:     (B_T, c, T_S)
    # fg_row_ref: (B_T, 1, c)   lane-major copy -> MXU channel reduction
    # fg_col_ref: (B_T, c, 1)   sublane copy    -> broadcast / projection
    # out_ref:    (B_T, 2c, T_S)
    b_t, c, t_s = fl_ref.shape

    for b in range(b_t):  # B_T is small (<= 8); static unroll, plain 2-D matmuls
        fl_b = fl_ref[b].astype(jnp.float32)            # (c, t_s)
        fg_row = fg_row_ref[b].astype(jnp.float32)      # (1, c)
        fg_col = fg_col_ref[b].astype(jnp.float32)      # (c, 1)

        # dot[0, s] = sum_c fg[c] * fl[c, s]  -> MXU (vector-matrix matmul)
        dot = jax.lax.dot_general(
            fg_row, fl_b,
            dimension_numbers=(((1,), (0,)), ((), ())),
            preferred_element_type=jnp.float32,
            precision=jax.lax.Precision.HIGHEST)        # (1, t_s)

        # 1 / ||fg||_2  (EUP rsqrt; reproduces PyTorch's divide-by-norm)
        inv_norm = jax.lax.rsqrt(
            jnp.sum(fg_row * fg_row, axis=1, keepdims=True))  # (1, 1)

        proj = (dot * inv_norm) * fg_col                # (c, t_s) via broadcast
        orth = fl_b - proj

        out_ref[b, 0:c, :] = orth.astype(out_ref.dtype)
        out_ref[b, c:2 * c, :] = jnp.broadcast_to(
            fg_col, (c, t_s)).astype(out_ref.dtype)


def _choose_tiles(bs, c, wh, itemsize):
    """Pick (B_T, T_S, wh_pad) so one double-buffered step fits ~40 MiB VMEM."""
    vmem_budget = 40 << 20            # conservative for v7x (64 MiB physical)
    wh_pad = _round_up(wh, 128)

    # Spatial tile: largest 128-multiple divisor of wh_pad under both the VMEM
    # budget and a ~4 MiB fl-tile target (enough to sit on the HBM roofline).
    per_lane_bytes = 3 * c * itemsize                       # fl + out per lane col
    budget_ts = max(128, (vmem_budget // (2 * per_lane_bytes)) // 128 * 128)
    target_ts = max(128, _round_up((4 << 20) // max(1, c * itemsize), 128))
    cap = min(wh_pad, budget_ts, target_ts)
    t_s = 128
    cand = 128
    while cand <= cap:
        if wh_pad % cand == 0:
            t_s = cand
        cand += 128

    # Batch packing: only when a single batch element's block is tiny.
    per_batch_bytes = (3 * c * t_s + 2 * c) * itemsize
    b_t = 1
    if per_batch_bytes < (1 << 20):
        for candidate in range(1, min(bs, 8) + 1):
            if bs % candidate == 0 and 2 * candidate * per_batch_bytes <= vmem_budget:
                b_t = candidate
    return b_t, t_s, wh_pad


def orthogonal_fusion(fl, fg):
    """fl: (bs, c, w, h), fg: (bs, c) -> (bs, 2c, w, h)."""
    bs, c, w, h = fl.shape
    assert fg.shape == (bs, c)
    wh = w * h
    itemsize = jnp.dtype(fl.dtype).itemsize

    b_t, t_s, wh_pad = _choose_tiles(bs, c, wh, itemsize)

    fl_flat = fl.reshape(bs, c, wh)
    if wh_pad != wh:  # pad spatial to a lane-aligned multiple of the tile
        fl_flat = jnp.pad(fl_flat, ((0, 0), (0, 0), (0, wh_pad - wh)))
    fg_row = fg.reshape(bs, 1, c)     # lane-major view for the MXU reduction
    fg_col = fg.reshape(bs, c, 1)     # sublane view for broadcast / projection

    grid = (bs // b_t, wh_pad // t_s)
    step_bytes = 2 * b_t * (3 * c * t_s + 2 * c) * itemsize   # double-buffered
    vmem_limit = int(max(32 << 20, min(56 << 20, step_bytes + (8 << 20))))

    out_flat = pl.pallas_call(
        _orthogonal_fusion_kernel,
        out_shape=jax.ShapeDtypeStruct((bs, 2 * c, wh_pad), fl.dtype),
        grid_spec=pltpu.PrefetchScalarGridSpec(
            num_scalar_prefetch=0,
            grid=grid,
            in_specs=[
                pl.BlockSpec((b_t, c, t_s), lambda b, s: (b, 0, s)),
                pl.BlockSpec((b_t, 1, c), lambda b, s: (b, 0, 0)),
                pl.BlockSpec((b_t, c, 1), lambda b, s: (b, 0, 0)),
            ],
            out_specs=pl.BlockSpec((b_t, 2 * c, t_s), lambda b, s: (b, 0, s)),
        ),
        compiler_params=pltpu.CompilerParams(
            dimension_semantics=("parallel", "parallel"),
            vmem_limit_bytes=vmem_limit,
        ),
    )(fl_flat, fg_row, fg_col)

    if wh_pad != wh:
        out_flat = out_flat[:, :, :wh]
    return out_flat.reshape(bs, 2 * c, w, h)


def _reference(fl, fg):
    bs, c, w, h = fl.shape
    fl_flat = fl.reshape(bs, c, -1)
    dot = jnp.einsum("bc,bcs->bs", fg, fl_flat,
                     precision=jax.lax.Precision.HIGHEST).reshape(bs, 1, w, h)
    norm = jnp.linalg.norm(fg, axis=1)
    proj = dot / norm[:, None, None, None] * fg[:, :, None, None]
    orth = fl - proj
    fg_map = jnp.broadcast_to(fg[:, :, None, None], (bs, c, w, h))
    return jnp.concatenate([orth, fg_map], axis=1)


if __name__ == "__main__":
    key = jax.random.PRNGKey(0)
    k1, k2, k3, k4 = jax.random.split(key, 4)

    # Primary small shape (lane-aligned spatial).
    bs, c, w, h = 2, 4, 16, 16
    fl = jax.random.normal(k1, (bs, c, w, h), dtype=jnp.float32)
    fg = jax.random.normal(k2, (bs, c), dtype=jnp.float32)
    out = jax.block_until_ready(orthogonal_fusion(fl, fg))
    ref = _reference(fl, fg)
    np.testing.assert_allclose(np.asarray(out), np.asarray(ref),
                               rtol=1e-5, atol=1e-5)

    # Non-128-aligned spatial exercises the padding path.
    bs2, c2, w2, h2 = 2, 8, 5, 5
    fl2 = jax.random.normal(k3, (bs2, c2, w2, h2), dtype=jnp.float32)
    fg2 = jax.random.normal(k4, (bs2, c2), dtype=jnp.float32)
    out2 = jax.block_until_ready(orthogonal_fusion(fl2, fg2))
    ref2 = _reference(fl2, fg2)
    np.testing.assert_allclose(np.asarray(out2), np.asarray(ref2),
                               rtol=1e-5, atol=1e-5)

    print("KERNEL_OK")
</pallas_src>

<mosaic_0001>
module attributes {stable_mosaic.version = 11 : i64} {
  func.func @_orthogonal_fusion_kernel(%arg0: i32, %arg1: i32, %arg2: memref<2x4x256xf32, #tpu.memory_space<vmem>>, %arg3: memref<2x1x4xf32, #tpu.memory_space<vmem>>, %arg4: memref<2x4x1xf32, #tpu.memory_space<vmem>>, %arg5: memref<2x8x256xf32, #tpu.memory_space<vmem>>) attributes {dimension_semantics = [#tpu.dimension_semantics<parallel>, #tpu.dimension_semantics<parallel>], iteration_bounds = array<i64: 1, 1>, scalar_prefetch = 0 : i64, scratch_operands = 0 : i64, tpu.core_type = #tpu.core_type<tc>, window_params = [{transform_indices = @transform_0, window_bounds = array<i64: 2, 4, 256>}, {transform_indices = @transform_1, window_bounds = array<i64: 2, 1, 4>}, {transform_indices = @transform_2, window_bounds = array<i64: 2, 4, 1>}, {transform_indices = @transform_3, window_bounds = array<i64: 2, 8, 256>}]} {
    %c0 = arith.constant 0 : index
    %c0_0 = arith.constant 0 : index
    %c0_1 = arith.constant 0 : index
    %0 = vector.load %arg2[%c0, %c0_0, %c0_1] : memref<2x4x256xf32, #tpu.memory_space<vmem>>, vector<1x4x256xf32>
    %1 = vector.shape_cast %0 : vector<1x4x256xf32> to vector<4x256xf32>
    %c0_2 = arith.constant 0 : index
    %c0_3 = arith.constant 0 : index
    %c0_4 = arith.constant 0 : index
    %2 = vector.load %arg3[%c0_2, %c0_3, %c0_4] : memref<2x1x4xf32, #tpu.memory_space<vmem>>, vector<1x1x4xf32>
    %3 = vector.shape_cast %2 : vector<1x1x4xf32> to vector<1x4xf32>
    %c0_5 = arith.constant 0 : index
    %c0_6 = arith.constant 0 : index
    %c0_7 = arith.constant 0 : index
    %4 = vector.load %arg4[%c0_5, %c0_6, %c0_7] : memref<2x4x1xf32, #tpu.memory_space<vmem>>, vector<1x4x1xf32>
    %5 = vector.shape_cast %4 : vector<1x4x1xf32> to vector<4x1xf32>
    %cst = arith.constant dense<0.000000e+00> : vector<1x256xf32>
    %6 = tpu.matmul %3, %1, %cst {dimension_numbers = #tpu.dot_dimension_numbers<[1], [0], [0], [1], [0, 0, 1, 1], [], []>, precision = #tpu.contract_precision<fp32>} : vector<1x4xf32>, vector<4x256xf32>, vector<1x256xf32> -> vector<1x256xf32>
    %7 = arith.mulf %3, %3 : vector<1x4xf32>
    %cst_8 = arith.constant dense<0.000000e+00> : vector<1xf32>
    %8 = vector.multi_reduction <add>, %7, %cst_8 [1] : vector<1x4xf32> to vector<1xf32>
    %9 = vector.shape_cast %8 : vector<1xf32> to vector<1x1xf32>
    %10 = math.rsqrt %9 : vector<1x1xf32>
    %11 = vector.broadcast %10 : vector<1x1xf32> to vector<1x256xf32>
    %12 = arith.mulf %6, %11 : vector<1x256xf32>
    %13 = vector.broadcast %12 : vector<1x256xf32> to vector<4x256xf32>
    %14 = vector.broadcast %5 : vector<4x1xf32> to vector<4x256xf32>
    %15 = arith.mulf %13, %14 : vector<4x256xf32>
    %16 = arith.subf %1, %15 : vector<4x256xf32>
    %c0_9 = arith.constant 0 : index
    %c0_10 = arith.constant 0 : index
    %c0_11 = arith.constant 0 : index
    %17 = vector.load %arg5[%c0_9, %c0_10, %c0_11] : memref<2x8x256xf32, #tpu.memory_space<vmem>>, vector<1x4x256xf32>
    %18 = vector.shape_cast %17 : vector<1x4x256xf32> to vector<4x256xf32>
    %19 = vector.shape_cast %16 : vector<4x256xf32> to vector<1x4x256xf32>
    tpu.vector_store %arg5[%c0_9, %c0_10, %c0_11], %19 {strides = array<i32>} : memref<2x8x256xf32, #tpu.memory_space<vmem>>, vector<1x4x256xf32>,
    %20 = vector.shape_cast %5 : vector<4x1xf32> to vector<4x1xf32>
    %21 = vector.broadcast %20 : vector<4x1xf32> to vector<4x256xf32>
    %c0_12 = arith.constant 0 : index
    %c4 = arith.constant 4 : index
    %c0_13 = arith.constant 0 : index
    %22 = vector.load %arg5[%c0_12, %c4, %c0_13] : memref<2x8x256xf32, #tpu.memory_space<vmem>>, vector<1x4x256xf32>
    %23 = vector.shape_cast %22 : vector<1x4x256xf32> to vector<4x256xf32>
    %24 = vector.shape_cast %21 : vector<4x256xf32> to vector<1x4x256xf32>
    tpu.vector_store %arg5[%c0_12, %c4, %c0_13], %24 {strides = array<i32>} : memref<2x8x256xf32, #tpu.memory_space<vmem>>, vector<1x4x256xf32>,
    %c1 = arith.constant 1 : index
    %c0_14 = arith.constant 0 : index
    %c0_15 = arith.constant 0 : index
    %25 = vector.load %arg2[%c1, %c0_14, %c0_15] : memref<2x4x256xf32, #tpu.memory_space<vmem>>, vector<1x4x256xf32>
    %26 = vector.shape_cast %25 : vector<1x4x256xf32> to vector<4x256xf32>
    %c1_16 = arith.constant 1 : index
    %c0_17 = arith.constant 0 : index
    %c0_18 = arith.constant 0 : index
    %27 = vector.load %arg3[%c1_16, %c0_17, %c0_18] : memref<2x1x4xf32, #tpu.memory_space<vmem>>, vector<1x1x4xf32>
    %28 = vector.shape_cast %27 : vector<1x1x4xf32> to vector<1x4xf32>
    %c1_19 = arith.constant 1 : index
    %c0_20 = arith.constant 0 : index
    %c0_21 = arith.constant 0 : index
    %29 = vector.load %arg4[%c1_19, %c0_20, %c0_21] : memref<2x4x1xf32, #tpu.memory_space<vmem>>, vector<1x4x1xf32>
    %30 = vector.shape_cast %29 : vector<1x4x1xf32> to vector<4x1xf32>
    %cst_22 = arith.constant dense<0.000000e+00> : vector<1x256xf32>
    %31 = tpu.matmul %28, %26, %cst_22 {dimension_numbers = #tpu.dot_dimension_numbers<[1], [0], [0], [1], [0, 0, 1, 1], [], []>, precision = #tpu.contract_precision<fp32>} : vector<1x4xf32>, vector<4x256xf32>, vector<1x256xf32> -> vector<1x256xf32>
    %32 = arith.mulf %28, %28 : vector<1x4xf32>
    %cst_23 = arith.constant dense<0.000000e+00> : vector<1xf32>
    %33 = vector.multi_reduction <add>, %32, %cst_23 [1] : vector<1x4xf32> to vector<1xf32>
    %34 = vector.shape_cast %33 : vector<1xf32> to vector<1x1xf32>
    %35 = math.rsqrt %34 : vector<1x1xf32>
    %36 = vector.broadcast %35 : vector<1x1xf32> to vector<1x256xf32>
    %37 = arith.mulf %31, %36 : vector<1x256xf32>
    %38 = vector.broadcast %37 : vector<1x256xf32> to vector<4x256xf32>
    %39 = vector.broadcast %30 : vector<4x1xf32> to vector<4x256xf32>
    %40 = arith.mulf %38, %39 : vector<4x256xf32>
    %41 = arith.subf %26, %40 : vector<4x256xf32>
    %c1_24 = arith.constant 1 : index
    %c0_25 = arith.constant 0 : index
    %c0_26 = arith.constant 0 : index
    %42 = vector.load %arg5[%c1_24, %c0_25, %c0_26] : memref<2x8x256xf32, #tpu.memory_space<vmem>>, vector<1x4x256xf32>
    %43 = vector.shape_cast %42 : vector<1x4x256xf32> to vector<4x256xf32>
    %44 = vector.shape_cast %41 : vector<4x256xf32> to vector<1x4x256xf32>
    tpu.vector_store %arg5[%c1_24, %c0_25, %c0_26], %44 {strides = array<i32>} : memref<2x8x256xf32, #tpu.memory_space<vmem>>, vector<1x4x256xf32>,
    %45 = vector.shape_cast %30 : vector<4x1xf32> to vector<4x1xf32>
    %46 = vector.broadcast %45 : vector<4x1xf32> to vector<4x256xf32>
    %c1_27 = arith.constant 1 : index
    %c4_28 = arith.constant 4 : index
    %c0_29 = arith.constant 0 : index
    %47 = vector.load %arg5[%c1_27, %c4_28, %c0_29] : memref<2x8x256xf32, #tpu.memory_space<vmem>>, vector<1x4x256xf32>
    %48 = vector.shape_cast %47 : vector<1x4x256xf32> to vector<4x256xf32>
    %49 = vector.shape_cast %46 : vector<4x256xf32> to vector<1x4x256xf32>
    tpu.vector_store %arg5[%c1_27, %c4_28, %c0_29], %49 {strides = array<i32>} : memref<2x8x256xf32, #tpu.memory_space<vmem>>, vector<1x4x256xf32>,
    return
  }
  func.func @transform_0(%arg0: i32, %arg1: i32) -> (i32, i32, i32) {
    %c0_i32 = arith.constant 0 : i32
    %c0_i32_0 = arith.constant 0 : i32
    return %arg0, %c0_i32, %arg1 : i32, i32, i32
  }
  func.func @transform_1(%arg0: i32, %arg1: i32) -> (i32, i32, i32) {
    %c0_i32 = arith.constant 0 : i32
    %c0_i32_0 = arith.constant 0 : i32
    %c0_i32_1 = arith.constant 0 : i32
    return %arg0, %c0_i32, %c0_i32_0 : i32, i32, i32
  }
  func.func @transform_2(%arg0: i32, %arg1: i32) -> (i32, i32, i32) {
    %c0_i32 = arith.constant 0 : i32
    %c0_i32_0 = arith.constant 0 : i32
    %c0_i32_1 = arith.constant 0 : i32
    return %arg0, %c0_i32, %c0_i32_0 : i32, i32, i32
  }
  func.func @transform_3(%arg0: i32, %arg1: i32) -> (i32, i32, i32) {
    %c0_i32 = arith.constant 0 : i32
    %c0_i32_0 = arith.constant 0 : i32
    return %arg0, %c0_i32, %arg1 : i32, i32, i32
  }
}

</mosaic_0001>

<bundles_post_ra>
// kernel: tpu_custom_call.1
= control target key start
LH: loop header
LB: loop body
LE: loop exit
PB: predicated region body
PF: predicated region fallthrough
CT: control target
= control target key end

     0   :  { %8 = vsyncpa [#allocation3], 0  ;;  %s1305_s0 = inlined_call_operand.hbm [shape: f32[2,4,256], index: 0, kind: input, shape index: {}]   ;;  %s1306_s1 = inlined_call_operand.vmem [shape: f32[2,1,4], index: 1, kind: input, shape index: {}]   ;;  %s1307_s2 = inlined_call_operand.vmem [shape: f32[2,4,1], index: 2, kind: input, shape index: {}]   ;;  %s1308_s3 = inlined_call_operand.hbm [shape: f32[2,8,256], index: 3, kind: output, shape index: {}]  }
   0x1   :  { %9 = vsyncpa [#allocation4], 0  ;;  %s1165_s12 = smov [#allocation2]   ;;  %s1117_s16 = scalar_lea.hbm %s1305_s0, 256 }
   0x2   :  { %s15_s13 = sshll.u32 %s1165_s12, 4  ;;  %p1118_p0 = scmp.ne.s32.totalorder %s1305_s0, %s1117_s16  ;;  %s16_s13 = int_to_ptr.vmem [resolvable:$true] %s15_s13 }
   0x3   :  { %p1121_p1 = scmp.lt.u32.totalorder %s1117_s16, %s1305_s0 }
   0x5   :  { %p1123_p2 = pnand %p1121_p1, %p1118_p0 }
   0x7   :  { %1126 = shalt.err (!%p1123_p2)
}
   0x8   :  { %s1127_s21 = scalar_lea.vmem %s16_s13, 256  ;;  %p1132_p4 = scmp.lt.s32.totalorder %s16_s13, %s16_s13 }
   0x9   :  { %p1128_p3 = scmp.ne.s32.totalorder %s16_s13, %s1127_s21  ;;  %p1133_p5 = scmp.lt.s32.totalorder %s1127_s21, %s1127_s21 }
   0xb   :  { %p1134_p6 = por %p1133_p5, %p1132_p4 }
   0xd   :  { %p1135_p7 = pnand %p1134_p6, %p1128_p3 }
   0xf   :  { %1138 = shalt.err (!%p1135_p7)
}
  0x10   :  { %s1166_s22 = smov 128   ;;  %s1167_s23 = smov 8  }
  0x11   :  { %21 = dma.hbm_to_vmem [thread:$0]  %s1305_s0, 256, %s16_s13, [#allocation3], %s1166_s22, %s1166_s22, %s1167_s23  }
  0x12   :  { %1161 = dma.done.wait [#allocation3], 256  }
  0x13   :  { %1162 = vsyncadd [#allocation3], 4294967040  ;;  %v1168_v0 = vmov 0.0   ;;  %v1169_v1 = vmov 0   ;;  %vm38_vm0 = vcmask 1043456   ;;  %vm34_vm1 = vcmask 31744  }
  0x14   :  { %109 = vmatprep.mubr.f32.mxu0 %v1168_v0  ;;  %626 = vmatprep.mubr.f32.mxu1 %v1168_v0  ;;  %v1207_v2 = vld [vmem:[#allocation2] sm:$0xff]  ;;  %v1209_v3 = vld [vmem:[#allocation2 + $0x8] sm:$0xff]  ;;  %vm509_vm2 = vcmask 24576   ;;  %v516_v56 = vlaneseq }
  0x15   :  { %1109 = vset.pattern.permute.xlu1 %v1169_v1  ;;  %1110 = vset.pattern.permute.xlu0 %v1169_v1  ;;  %v30_v4 = vld [vmem:[%s1306_s1] sm:$0x1]  ;;  %v33_v5 = vcombine.high %v1207_v2, %v1207_v2  ;;  %v552_v6 = vcombine.high %v1209_v3, %v1209_v3  ;;  %v39_v7 = vsel %vm38_vm0, %v1207_v2, 0  ;;  %v556_v8 = vsel %vm38_vm0, %v1209_v3, 0  ;;  %v1079_v9 = vld [vmem:[%s1306_s1 + $0x1] sm:$0x1] }
  0x16   :  { %v31_v10 = vld [vmem:[%s1307_s2] sm:$0xf]  ;;  %v1228_v11 = vand.u32 4294901760, %v39_v7  ;;  %v1230_v12 = vand.u32 4294901760, %v556_v8  ;;  %v36_v13 = vsel %vm34_vm1, %v30_v4, 0  ;;  %v554_v14 = vsel %vm34_vm1, %v1079_v9, 0 }
  0x17   :  { %526 = vperm.xlu1 %1109, %v31_v10   ;;  %v41_v15 = vsel %vm38_vm0, %v33_v5, 0  ;;  %v558_v16 = vsel %vm38_vm0, %v552_v6, 0  ;;  %v1234_v17 = vand.u32 4294901760, %v36_v13  ;;  %v1236_v18 = vand.u32 4294901760, %v554_v14  ;;  %v1080_v27 = vld [vmem:[%s1307_s2 + $0x4] sm:$0xf] }
  0x18   :  { %v1238_v19 = vand.u32 4294901760, %v41_v15  ;;  %v1240_v20 = vand.u32 4294901760, %v558_v16  ;;  %v1243_v21 = vsub.f32 %v39_v7, %v1228_v11  ;;  %v1246_v22 = vsub.f32 %v556_v8, %v1230_v12  ;;  %s1170_s2 = smov [#allocation5]  }
  0x19   :  { %v111_v23 = vsub.f32 %v36_v13, %v1234_v17  ;;  %v628_v24 = vsub.f32 %v554_v14, %v1236_v18  ;;  %v508_v25 = vmul.f32 %v30_v4, %v30_v4  ;;  %v1025_v26 = vmul.f32 %v1079_v9, %v1079_v9  ;;  %s1067_s5 = sshll.u32 %s1170_s2, 4  ;;  %s1068_s5 = int_to_ptr.vmem [resolvable:$true] %s1067_s5 }
  0x1a   :  { %44 = vmatprep.subr.mxu0 %v1238_v19  ;;  %561 = vmatprep.subr.mxu1 %v1240_v20  ;;  %v122_v28 = vsub.f32 %v41_v15, %v1238_v19  ;;  %v639_v29 = vsub.f32 %v558_v16, %v1240_v20  ;;  %v129_v30 = vand.u32 4294901760, %v1243_v21  ;;  %v646_v31 = vand.u32 4294901760, %v1246_v22  ;;  %s1139_s6 = scalar_lea.vmem %s1068_s5, 512  ;;  %p1144_p9 = scmp.lt.s32.totalorder %s1068_s5, %s1068_s5 }
  0x1b   :  { %46 = vmatpush1.msra.mxu0 %v1228_v11  ;;  %563 = vmatpush1.msra.mxu1 %v1230_v12  ;;  %v112_v32 = vand.u32 4294901760, %v111_v23  ;;  %v629_v33 = vand.u32 4294901760, %v628_v24  ;;  %v510_v34 = vsel %vm509_vm2, %v508_v25, 0.0  ;;  %v1026_v41 = vsel %vm509_vm2, %v1025_v26, 0.0  ;;  %p1140_p8 = scmp.ne.s32.totalorder %s1068_s5, %s1139_s6  ;;  %p1145_p10 = scmp.lt.s32.totalorder %s1139_s6, %s1139_s6 }
  0x1c   :  { %v123_v35 = vand.u32 4294901760, %v122_v28  ;;  %v640_v36 = vand.u32 4294901760, %v639_v29  ;;  %v130_v37 = vsub.f32 %v1243_v21, %v129_v30  ;;  %v647_v38 = vsub.f32 %v1246_v22, %v646_v31  ;;  %511 = vadd.xlane.f32.xlu0 %v510_v34  ;;  %1042 = vperm.xlu1 %1109, %v1080_v27  }
  0x1d   :  { %v113_v39 = vsub.f32 %v111_v23, %v112_v32  ;;  %v630_v40 = vsub.f32 %v628_v24, %v629_v33  ;;  %v517_v57 = vshrl.u32 %v516_v56, 7  ;;  %p1146_p11 = por %p1145_p10, %p1144_p9 }
  0x1e   :  { %v124_v42 = vsub.f32 %v122_v28, %v123_v35  ;;  %v641_v43 = vsub.f32 %v639_v29, %v640_v36  ;;  %v131_v46 = vand.u32 4294901760, %v130_v37  ;;  %v648_v47 = vand.u32 4294901760, %v647_v38 }
  0x1f   :  { %v114_v44 = vand.u32 4294901760, %v113_v39  ;;  %v631_v45 = vand.u32 4294901760, %v630_v40  ;;  %v518_v59 = vsub.s32 0, %v517_v57  ;;  %p1147_p12 = pnand %p1146_p11, %p1140_p8 }
  0x20   :  { %v125_v48 = vand.u32 4294901760, %v124_v42  ;;  %v642_v49 = vand.u32 4294901760, %v641_v43  ;;  %1027 = vadd.xlane.f32.xlu0 %v1026_v41 }
  0x21   :  { %115 = vmatmul.mubr.f32.vlgmr.msra.gmra.mrb[0].mxu0 %v114_v44  ;;  %632 = vmatmul.mubr.f32.vlgmr.msra.gmra.mrb[0].mxu1 %v631_v45 }
  0x22   :  { %126 = vmatprep.subr.mxu0 %v125_v48  ;;  %643 = vmatprep.subr.mxu1 %v642_v49 }
  0x23   :  { %132 = vmatpush1.msra.mxu0 %v131_v46  ;;  %649 = vmatpush1.msra.mxu1 %v648_v47 }
  0x24   :  { %195 = vmatprep.mubr.f32.mxu0 %v1168_v0  ;;  %712 = vmatprep.mubr.f32.mxu1 %v1168_v0 }
  0x25   :  { %205 = vmatprep.subr.mxu0 %v122_v28  ;;  %722 = vmatprep.subr.mxu1 %v639_v29 }
  0x29   :  { %197 = vmatmul.mubr.f32.vlgmr.msra.gmra.mrb[0].mxu0 %v1234_v17  ;;  %714 = vmatmul.mubr.f32.vlgmr.msra.gmra.mrb[0].mxu1 %v1236_v18 }
  0x2a   :  { %208 = vmatpush1.msra.mxu0 %v1243_v21  ;;  %725 = vmatpush1.msra.mxu1 %v1246_v22 }
  0x2b   :  { %271 = vmatprep.mubr.f32.mxu0 %v1168_v0  ;;  %788 = vmatprep.mubr.f32.mxu1 %v1168_v0 }
  0x2c   :  { %281 = vmatprep.subr.mxu0 %v1238_v19  ;;  %798 = vmatprep.subr.mxu1 %v1240_v20 }
  0x31   :  { %274 = vmatmul.mubr.f32.vlgmr.msra.gmra.mrb[0].mxu0 %v111_v23  ;;  %791 = vmatmul.mubr.f32.vlgmr.msra.gmra.mrb[0].mxu1 %v628_v24 }
  0x32   :  { %283 = vmatpush1.msra.mxu0 %v1228_v11  ;;  %800 = vmatpush1.msra.mxu1 %v1230_v12 }
  0x33   :  { %346 = vmatprep.mubr.f32.mxu0 %v1168_v0  ;;  %863 = vmatprep.mubr.f32.mxu1 %v1168_v0 }
  0x34   :  { %359 = vmatprep.subr.mxu0 %v123_v35  ;;  %876 = vmatprep.subr.mxu1 %v640_v36 }
  0x39   :  { %350 = vmatmul.mubr.f32.vlgmr.msra.gmra.mrb[0].mxu0 %v112_v32  ;;  %867 = vmatmul.mubr.f32.vlgmr.msra.gmra.mrb[0].mxu1 %v629_v33 }
  0x3a   :  { %363 = vmatpush1.msra.mxu0 %v129_v30  ;;  %880 = vmatpush1.msra.mxu1 %v646_v31 }
  0x3b   :  { %426 = vmatprep.mubr.f32.mxu0 %v1168_v0  ;;  %943 = vmatprep.mubr.f32.mxu1 %v1168_v0 }
  0x3c   :  { %435 = vmatprep.subr.mxu0 %v1238_v19  ;;  %952 = vmatprep.subr.mxu1 %v1240_v20 }
  0x41   :  { %428 = vmatmul.mubr.f32.vlgmr.msra.gmra.mrb[0].mxu0 %v1234_v17  ;;  %945 = vmatmul.mubr.f32.vlgmr.msra.gmra.mrb[0].mxu1 %v1236_v18 }
  0x42   :  { %437 = vmatpush1.msra.mxu0 %v1228_v11  ;;  %954 = vmatpush1.msra.mxu1 %v1230_v12 }
  0x43   :  { %500 = vmatprep.mubr.f32.mxu0 %v1168_v0  ;;  %1017 = vmatprep.mubr.f32.mxu1 %v1168_v0 }
  0x49   :  { %502 = vmatmul.mubr.f32.vlgmr.msra.gmra.mrb[0].mxu0 %v1234_v17  ;;  %1019 = vmatmul.mubr.f32.vlgmr.msra.gmra.mrb[0].mxu1 %v1236_v18 }
  0x96   :  { %v527_v50 = vpop.permute.xlu1 %526 }
  0x97   :  { %v541_v52 = vrot.slane %v527_v50, 4 }
  0x99   :  { %543 = vst [vmem:[#allocation5] sm:$0xf0] %v541_v52  ;;  %544 = vst [vmem:[#allocation5 + $0x8] sm:$0xf0] %v541_v52 }
  0x9b   :  { %v1043_v51 = vpop.permute.xlu1 %1042 }
  0x9c   :  { %v1058_v53 = vrot.slane %v1043_v51, 4 }
  0x9e   :  { %1060 = vst [vmem:[#allocation5 + $0x10] sm:$0xf0] %v1058_v53  ;;  %1061 = vst [vmem:[#allocation5 + $0x18] sm:$0xf0] %v1058_v53 }
  0xa9   :  { %v512_v54 = vpop.xlane.xlu0 %511 }
  0xad   :  { %v1028_v55 = vpop.xlane.xlu0 %1027 }
  0xae   :  { %1113 = vrsqrt.f32 %v1028_v55 }
  0xaf   :  { %1115 = vrsqrt.f32 %v512_v54 }
  0xb8   :  { %v1114_v58 = vpop.eup %1113 }
  0xb9   :  { %v1116_v60 = vpop.eup %1115 }
 0x11c   :  { %v1020_v61 = vpop.f32.mrb[0].mxu1  ;;  %v503_v62 = vpop.f32.mrb[0].mxu0 }
 0x11d   :  { %v1030_v63 = vmul.f32 %v1114_v58, %v1020_v61  ;;  %v514_v0 = vmul.f32 %v1116_v60, %v503_v62  ;;  %v505_v1 = vpop.f32.mrb[1].mxu0  ;;  %v1022_v4 = vpop.f32.mrb[1].mxu1 }
 0x11e   :  { %v515_v5 = vmul.f32 %v1116_v60, %v505_v1  ;;  %v1031_v6 = vmul.f32 %v1114_v58, %v1022_v4 }
 0x11f   :  { %v1035_v7 = vrot.slane %v1030_v63, %v518_v59  ;;  %v519_v8 = vrot.slane %v514_v0, %v518_v59 }
 0x120   :  { %v523_v9 = vrot.slane %v515_v5, %v518_v59  ;;  %v1039_v10 = vrot.slane %v1031_v6, %v518_v59 }
 0x121   :  { %v529_v11 = vmul.f32 %v527_v50, %v519_v8  ;;  %v1045_v12 = vmul.f32 %v1043_v51, %v1035_v7 }
 0x122   :  { %v530_v13 = vmul.f32 %v527_v50, %v523_v9  ;;  %v1046_v14 = vmul.f32 %v1043_v51, %v1039_v10 }
 0x124   :  { %v533_v15 = vcombine.low %v529_v11, %v530_v13  ;;  %v1049_v16 = vcombine.low %v1045_v12, %v1046_v14 }
 0x126   :  { %v535_v17 = vsub.f32 %v1207_v2, %v533_v15  ;;  %v1051_v18 = vsub.f32 %v1209_v3, %v1049_v16 }
 0x128   :  { %v537_v19 = vcombine.high %v535_v17, %v535_v17  ;;  %539 = vst [vmem:[#allocation5] sm:$0xf] %v535_v17  ;;  %v1053_v20 = vcombine.high %v1051_v18, %v1051_v18  ;;  %1056 = vst [vmem:[#allocation5 + $0x10] sm:$0xf] %v1051_v18 }
 0x12a   :  { %540 = vst [vmem:[#allocation5 + $0x8] sm:$0xf] %v537_v19  ;;  %1057 = vst [vmem:[#allocation5 + $0x18] sm:$0xf] %v1053_v20 }
 0x12b   :  { %1150 = shalt.err (!%p1147_p12)
}
 0x12c   :  { %s1151_s9 = scalar_lea.hbm %s1308_s3, 512 }
 0x12d   :  { %p1152_p13 = scmp.ne.s32.totalorder %s1308_s3, %s1151_s9  ;;  %p1155_p0 = scmp.lt.u32.totalorder %s1151_s9, %s1308_s3 }
 0x12f   :  { %p1157_p1 = pnand %p1155_p0, %p1152_p13 }
 0x131   :  { %1160 = shalt.err (!%p1157_p1)
}
 0x132   :  { %s1171_s14 = smov 256   ;;  %s1172_s15 = smov 16  }
 0x133   :  { %1073 = dma.vmem_to_hbm [thread:$0]  %s1068_s5, 512, %s1308_s3, [#allocation4], %s1171_s14, %s1171_s14, %s1172_s15  }
 0x134   :  { %1163 = dma.done.wait [#allocation4], 512  }
 0x135   :  { %1164 = vsyncadd [#allocation4], 4294966784 }
 0x136   :  { %1077 = vsyncpa [#allocation3], 1 }
 0x137   :  { %1078 = vsyncpa [#allocation4], 1 }

</bundles_post_ra>
